<compile_context>
chip_gen: v7x
topology: tpu7x:2x2x1
jax: 0.10.0
libtpu: 0.0.40
codegen_flags: <defaults>
</compile_context>

<pallas_src>
import jax
import jax.numpy as jnp
from jax.experimental import pallas as pl
from jax.experimental.pallas import tpu as pltpu


# ------------------------------- Fused kernel --------------------------------

def _fused_step_kernel(
    # scalar-prefetch (SMEM)
    ids_ref,                                  # int32 [B]
    # model_type params (VMEM)
    emb_type_ref, wx_type_ref, wh_type_ref, b_type_ref,
    wdec_type_ref, bdec_type_ref,
    # model_type_to_word params (VMEM)
    emb_word_ref, wx_word_tok_ref, wx_word_type_ref,
    wh_word_ref, b_word_ref, wdec_word_ref, bdec_word_ref,
    # carried hidden state (VMEM)
    h_word_ref, h_type_ref,
    # outputs (VMEM)
    logits_ref, h_word_out_ref, h_type_out_ref,
):
    B = h_type_ref.shape[0]

    # ---- in-kernel embedding gather: dynamic row slices of VMEM tables ----
    x_type_rows = []
    x_word_rows = []
    for i in range(B):                        # B is small & static
        tok = ids_ref[i]                      # SMEM scalar
        x_type_rows.append(emb_type_ref[pl.ds(tok, 1), :])
        x_word_rows.append(emb_word_ref[pl.ds(tok, 1), :])
    x_type = jnp.concatenate(x_type_rows, axis=0)       # [B, E]
    x_word = jnp.concatenate(x_word_rows, axis=0)       # [B, E]

    # ---- model_type: tanh RNN cell + decoder (emb_out=True) ----
    pre_type = (
        jnp.dot(x_type, wx_type_ref[...], preferred_element_type=jnp.float32)
        + jnp.dot(h_type_ref[...], wh_type_ref[...], preferred_element_type=jnp.float32)
        + b_type_ref[...]
    )
    h_type_new = jnp.tanh(pre_type)                     # [B, H]
    output_type = (
        jnp.dot(h_type_new, wdec_type_ref[...], preferred_element_type=jnp.float32)
        + bdec_type_ref[...]
    )                                                   # [B, E]

    # ---- model_type_to_word: concat-free (wx split into token / type halves) ----
    pre_word = (
        jnp.dot(x_word, wx_word_tok_ref[...], preferred_element_type=jnp.float32)
        + jnp.dot(output_type, wx_word_type_ref[...], preferred_element_type=jnp.float32)
        + jnp.dot(h_word_ref[...], wh_word_ref[...], preferred_element_type=jnp.float32)
        + b_word_ref[...]
    )
    h_word_new = jnp.tanh(pre_word)                     # [B, H]
    logits = (
        jnp.dot(h_word_new, wdec_word_ref[...], preferred_element_type=jnp.float32)
        + bdec_word_ref[...]
    )                                                   # [B, V]

    logits_ref[...] = logits.astype(logits_ref.dtype)
    h_word_out_ref[...] = h_word_new.astype(h_word_out_ref.dtype)
    h_type_out_ref[...] = h_type_new.astype(h_type_out_ref.dtype)


def fused_step(params, word_ids, h_word, h_type):
    """One fused forward step. word_ids: int32 [B]; h_*: f32 [B, H]."""
    B, H = h_word.shape
    V = params["wdec_word"].shape[1]

    operands = (
        params["emb_type_in"], params["wx_type"], params["wh_type"], params["b_type"],
        params["wdec_type"], params["bdec_type"],
        params["emb_word"], params["wx_word_tok"], params["wx_word_type"],
        params["wh_word"], params["b_word"], params["wdec_word"], params["bdec_word"],
        h_word, h_type,
    )

    def full_spec(arr_shape):
        # whole-array block, resident in VMEM; index_map gets (grid_i, ids_ref)
        return pl.BlockSpec(arr_shape, lambda i, ids: (0,) * len(arr_shape))

    grid_spec = pltpu.PrefetchScalarGridSpec(
        num_scalar_prefetch=1,                 # word_ids -> SMEM
        grid=(1,),
        in_specs=[full_spec(op.shape) for op in operands],
        out_specs=[full_spec((B, V)), full_spec((B, H)), full_spec((B, H))],
    )

    logits, h_word_new, h_type_new = pl.pallas_call(
        _fused_step_kernel,
        out_shape=(
            jax.ShapeDtypeStruct((B, V), jnp.float32),
            jax.ShapeDtypeStruct((B, H), jnp.float32),
            jax.ShapeDtypeStruct((B, H), jnp.float32),
        ),
        grid_spec=grid_spec,
        compiler_params=pltpu.CompilerParams(dimension_semantics=("arbitrary",)),
    )(word_ids, *operands)
    return logits, h_word_new, h_type_new


# ------------------------------ Parameter init -------------------------------

def init_params(key, vocab=32, emb=32, hidden=32):
    ks = jax.random.split(key, 10)
    s = 0.1
    return {
        # model_type (token -> type embedding)
        "emb_type_in":  s * jax.random.normal(ks[0], (vocab, emb), jnp.float32),
        "wx_type":      s * jax.random.normal(ks[1], (emb, hidden), jnp.float32),
        "wh_type":      s * jax.random.normal(ks[2], (hidden, hidden), jnp.float32),
        "b_type":       jnp.zeros((1, hidden), jnp.float32),
        "wdec_type":    s * jax.random.normal(ks[3], (hidden, emb), jnp.float32),
        "bdec_type":    jnp.zeros((1, emb), jnp.float32),
        # model_type_to_word (token + type embedding -> word logits);
        # wx is pre-split into token / type halves (replaces the concat).
        "emb_word":     s * jax.random.normal(ks[4], (vocab, emb), jnp.float32),
        "wx_word_tok":  s * jax.random.normal(ks[5], (emb, hidden), jnp.float32),
        "wx_word_type": s * jax.random.normal(ks[6], (emb, hidden), jnp.float32),
        "wh_word":      s * jax.random.normal(ks[7], (hidden, hidden), jnp.float32),
        "b_word":       jnp.zeros((1, hidden), jnp.float32),
        "wdec_word":    s * jax.random.normal(ks[8], (hidden, vocab), jnp.float32),
        "bdec_word":    jnp.zeros((1, vocab), jnp.float32),
    }


def init_hidden(bsz, hidden=32):
    # mirrors combined_model.init_hidden: (word-model hidden, type-model hidden)
    return (jnp.zeros((bsz, hidden), jnp.float32),
            jnp.zeros((bsz, hidden), jnp.float32))


# ------------------------------- Forward pass ---------------------------------

def combined_forward(params, word_ids, hidden, return_h=True):
    """word_ids: int32 [B]; hidden: (h_word [B,H], h_type [B,H])."""
    h_word, h_type = hidden
    logits, h_word_new, h_type_new = fused_step(params, word_ids, h_word, h_type)

    rnn_hs = h_word_new[None]          # [1, B, H]  (seq dim restored)
    dropped_rnn_hs = rnn_hs            # eval mode: no dropout
    if return_h:
        return logits, (h_word_new, h_type_new), rnn_hs, dropped_rnn_hs
    return logits, (h_word_new, h_type_new)


# ------------------------- Pure-JAX reference (check) -------------------------

def reference_forward(params, word_ids, hidden):
    h_word, h_type = hidden
    x_type = params["emb_type_in"][word_ids]
    h_type_new = jnp.tanh(x_type @ params["wx_type"]
                          + h_type @ params["wh_type"] + params["b_type"])
    output_type = h_type_new @ params["wdec_type"] + params["bdec_type"]
    x_word = params["emb_word"][word_ids]
    h_word_new = jnp.tanh(x_word @ params["wx_word_tok"]
                          + output_type @ params["wx_word_type"]
                          + h_word @ params["wh_word"] + params["b_word"])
    logits = h_word_new @ params["wdec_word"] + params["bdec_word"]
    return logits, (h_word_new, h_type_new)


# ------------------------------------ Main ------------------------------------

if __name__ == "__main__":
    B, V, E, H = 2, 32, 32, 32
    key = jax.random.PRNGKey(0)
    pkey, ikey = jax.random.split(key)

    params = init_params(pkey, vocab=V, emb=E, hidden=H)
    word_ids = jax.random.randint(ikey, (B,), 0, V, dtype=jnp.int32)
    hidden = init_hidden(B, hidden=H)

    fwd = jax.jit(lambda p, w, h: combined_forward(p, w, h, return_h=True))
    output, new_hidden, rnn_hs, dropped_rnn_hs = fwd(params, word_ids, hidden)
    jax.block_until_ready((output, new_hidden, rnn_hs, dropped_rnn_hs))

    # shape / sanity checks
    assert output.shape == (B, V)
    assert new_hidden[0].shape == (B, H) and new_hidden[1].shape == (B, H)
    assert rnn_hs.shape == (1, B, H) and dropped_rnn_hs.shape == (1, B, H)
    assert jnp.all(jnp.isfinite(output))

    # numeric check against a pure-JAX reference
    ref_logits, (ref_hw, ref_ht) = reference_forward(params, word_ids, hidden)
    assert jnp.max(jnp.abs(output - ref_logits)) < 1e-3
    assert jnp.max(jnp.abs(new_hidden[0] - ref_hw)) < 1e-3
    assert jnp.max(jnp.abs(new_hidden[1] - ref_ht)) < 1e-3

    print("KERNEL_OK")
</pallas_src>

<mosaic_0001>
module attributes {stable_mosaic.version = 11 : i64} {
  func.func @_fused_step_kernel(%arg0: i32, %arg1: memref<2xi32, #tpu.memory_space<smem>>, %arg2: memref<32x32xf32, #tpu.memory_space<vmem>>, %arg3: memref<32x32xf32, #tpu.memory_space<vmem>>, %arg4: memref<32x32xf32, #tpu.memory_space<vmem>>, %arg5: memref<1x32xf32, #tpu.memory_space<vmem>>, %arg6: memref<32x32xf32, #tpu.memory_space<vmem>>, %arg7: memref<1x32xf32, #tpu.memory_space<vmem>>, %arg8: memref<32x32xf32, #tpu.memory_space<vmem>>, %arg9: memref<32x32xf32, #tpu.memory_space<vmem>>, %arg10: memref<32x32xf32, #tpu.memory_space<vmem>>, %arg11: memref<32x32xf32, #tpu.memory_space<vmem>>, %arg12: memref<1x32xf32, #tpu.memory_space<vmem>>, %arg13: memref<32x32xf32, #tpu.memory_space<vmem>>, %arg14: memref<1x32xf32, #tpu.memory_space<vmem>>, %arg15: memref<2x32xf32, #tpu.memory_space<vmem>>, %arg16: memref<2x32xf32, #tpu.memory_space<vmem>>, %arg17: memref<2x32xf32, #tpu.memory_space<vmem>>, %arg18: memref<2x32xf32, #tpu.memory_space<vmem>>, %arg19: memref<2x32xf32, #tpu.memory_space<vmem>>) attributes {dimension_semantics = [#tpu.dimension_semantics<arbitrary>], iteration_bounds = array<i64: 1>, scalar_prefetch = 1 : i64, scratch_operands = 0 : i64, tpu.core_type = #tpu.core_type<tc>, window_params = [{pipeline_mode = #tpu.pipeline_mode<synchronous>, transform_indices = @transform_0, window_bounds = array<i64: 32, 32>}, {pipeline_mode = #tpu.pipeline_mode<synchronous>, transform_indices = @transform_1, window_bounds = array<i64: 32, 32>}, {pipeline_mode = #tpu.pipeline_mode<synchronous>, transform_indices = @transform_2, window_bounds = array<i64: 32, 32>}, {pipeline_mode = #tpu.pipeline_mode<synchronous>, transform_indices = @transform_3, window_bounds = array<i64: 1, 32>}, {pipeline_mode = #tpu.pipeline_mode<synchronous>, transform_indices = @transform_4, window_bounds = array<i64: 32, 32>}, {pipeline_mode = #tpu.pipeline_mode<synchronous>, transform_indices = @transform_5, window_bounds = array<i64: 1, 32>}, {pipeline_mode = #tpu.pipeline_mode<synchronous>, transform_indices = @transform_6, window_bounds = array<i64: 32, 32>}, {pipeline_mode = #tpu.pipeline_mode<synchronous>, transform_indices = @transform_7, window_bounds = array<i64: 32, 32>}, {pipeline_mode = #tpu.pipeline_mode<synchronous>, transform_indices = @transform_8, window_bounds = array<i64: 32, 32>}, {pipeline_mode = #tpu.pipeline_mode<synchronous>, transform_indices = @transform_9, window_bounds = array<i64: 32, 32>}, {pipeline_mode = #tpu.pipeline_mode<synchronous>, transform_indices = @transform_10, window_bounds = array<i64: 1, 32>}, {pipeline_mode = #tpu.pipeline_mode<synchronous>, transform_indices = @transform_11, window_bounds = array<i64: 32, 32>}, {pipeline_mode = #tpu.pipeline_mode<synchronous>, transform_indices = @transform_12, window_bounds = array<i64: 1, 32>}, {pipeline_mode = #tpu.pipeline_mode<synchronous>, transform_indices = @transform_13, window_bounds = array<i64: 2, 32>}, {pipeline_mode = #tpu.pipeline_mode<synchronous>, transform_indices = @transform_14, window_bounds = array<i64: 2, 32>}, {pipeline_mode = #tpu.pipeline_mode<synchronous>, transform_indices = @transform_15, window_bounds = array<i64: 2, 32>}, {pipeline_mode = #tpu.pipeline_mode<synchronous>, transform_indices = @transform_16, window_bounds = array<i64: 2, 32>}, {pipeline_mode = #tpu.pipeline_mode<synchronous>, transform_indices = @transform_17, window_bounds = array<i64: 2, 32>}]} {
    %c0 = arith.constant 0 : index
    %0 = memref.load %arg1[%c0] : memref<2xi32, #tpu.memory_space<smem>>
    %1 = arith.index_cast %0 : i32 to index
    %c0_0 = arith.constant 0 : index
    %2 = vector.load %arg2[%1, %c0_0] : memref<32x32xf32, #tpu.memory_space<vmem>>, vector<1x32xf32>
    %3 = arith.index_cast %0 : i32 to index
    %c0_1 = arith.constant 0 : index
    %4 = vector.load %arg8[%3, %c0_1] : memref<32x32xf32, #tpu.memory_space<vmem>>, vector<1x32xf32>
    %c1 = arith.constant 1 : index
    %5 = memref.load %arg1[%c1] : memref<2xi32, #tpu.memory_space<smem>>
    %6 = arith.index_cast %5 : i32 to index
    %c0_2 = arith.constant 0 : index
    %7 = vector.load %arg2[%6, %c0_2] : memref<32x32xf32, #tpu.memory_space<vmem>>, vector<1x32xf32>
    %8 = arith.index_cast %5 : i32 to index
    %c0_3 = arith.constant 0 : index
    %9 = vector.load %arg8[%8, %c0_3] : memref<32x32xf32, #tpu.memory_space<vmem>>, vector<1x32xf32>
    %10 = tpu.concatenate %2, %7 in 0 : vector<1x32xf32>, vector<1x32xf32> -> vector<2x32xf32>
    %11 = tpu.concatenate %4, %9 in 0 : vector<1x32xf32>, vector<1x32xf32> -> vector<2x32xf32>
    %c0_4 = arith.constant 0 : index
    %c0_5 = arith.constant 0 : index
    %12 = vector.load %arg3[%c0_4, %c0_5] : memref<32x32xf32, #tpu.memory_space<vmem>>, vector<32x32xf32>
    %cst = arith.constant dense<0.000000e+00> : vector<2x32xf32>
    %13 = tpu.matmul %10, %12, %cst {dimension_numbers = #tpu.dot_dimension_numbers<[1], [0], [0], [1], [0, 0, 1, 1], [], []>} : vector<2x32xf32>, vector<32x32xf32>, vector<2x32xf32> -> vector<2x32xf32>
    %c0_6 = arith.constant 0 : index
    %c0_7 = arith.constant 0 : index
    %14 = vector.load %arg16[%c0_6, %c0_7] : memref<2x32xf32, #tpu.memory_space<vmem>>, vector<2x32xf32>
    %c0_8 = arith.constant 0 : index
    %c0_9 = arith.constant 0 : index
    %15 = vector.load %arg4[%c0_8, %c0_9] : memref<32x32xf32, #tpu.memory_space<vmem>>, vector<32x32xf32>
    %cst_10 = arith.constant dense<0.000000e+00> : vector<2x32xf32>
    %16 = tpu.matmul %14, %15, %cst_10 {dimension_numbers = #tpu.dot_dimension_numbers<[1], [0], [0], [1], [0, 0, 1, 1], [], []>} : vector<2x32xf32>, vector<32x32xf32>, vector<2x32xf32> -> vector<2x32xf32>
    %17 = arith.addf %13, %16 : vector<2x32xf32>
    %c0_11 = arith.constant 0 : index
    %c0_12 = arith.constant 0 : index
    %18 = vector.load %arg5[%c0_11, %c0_12] : memref<1x32xf32, #tpu.memory_space<vmem>>, vector<1x32xf32>
    %19 = vector.broadcast %18 : vector<1x32xf32> to vector<2x32xf32>
    %20 = arith.addf %17, %19 : vector<2x32xf32>
    %21 = math.tanh %20 : vector<2x32xf32>
    %c0_13 = arith.constant 0 : index
    %c0_14 = arith.constant 0 : index
    %22 = vector.load %arg6[%c0_13, %c0_14] : memref<32x32xf32, #tpu.memory_space<vmem>>, vector<32x32xf32>
    %cst_15 = arith.constant dense<0.000000e+00> : vector<2x32xf32>
    %23 = tpu.matmul %21, %22, %cst_15 {dimension_numbers = #tpu.dot_dimension_numbers<[1], [0], [0], [1], [0, 0, 1, 1], [], []>} : vector<2x32xf32>, vector<32x32xf32>, vector<2x32xf32> -> vector<2x32xf32>
    %c0_16 = arith.constant 0 : index
    %c0_17 = arith.constant 0 : index
    %24 = vector.load %arg7[%c0_16, %c0_17] : memref<1x32xf32, #tpu.memory_space<vmem>>, vector<1x32xf32>
    %25 = vector.broadcast %24 : vector<1x32xf32> to vector<2x32xf32>
    %26 = arith.addf %23, %25 : vector<2x32xf32>
    %c0_18 = arith.constant 0 : index
    %c0_19 = arith.constant 0 : index
    %27 = vector.load %arg9[%c0_18, %c0_19] : memref<32x32xf32, #tpu.memory_space<vmem>>, vector<32x32xf32>
    %cst_20 = arith.constant dense<0.000000e+00> : vector<2x32xf32>
    %28 = tpu.matmul %11, %27, %cst_20 {dimension_numbers = #tpu.dot_dimension_numbers<[1], [0], [0], [1], [0, 0, 1, 1], [], []>} : vector<2x32xf32>, vector<32x32xf32>, vector<2x32xf32> -> vector<2x32xf32>
    %c0_21 = arith.constant 0 : index
    %c0_22 = arith.constant 0 : index
    %29 = vector.load %arg10[%c0_21, %c0_22] : memref<32x32xf32, #tpu.memory_space<vmem>>, vector<32x32xf32>
    %cst_23 = arith.constant dense<0.000000e+00> : vector<2x32xf32>
    %30 = tpu.matmul %26, %29, %cst_23 {dimension_numbers = #tpu.dot_dimension_numbers<[1], [0], [0], [1], [0, 0, 1, 1], [], []>} : vector<2x32xf32>, vector<32x32xf32>, vector<2x32xf32> -> vector<2x32xf32>
    %31 = arith.addf %28, %30 : vector<2x32xf32>
    %c0_24 = arith.constant 0 : index
    %c0_25 = arith.constant 0 : index
    %32 = vector.load %arg15[%c0_24, %c0_25] : memref<2x32xf32, #tpu.memory_space<vmem>>, vector<2x32xf32>
    %c0_26 = arith.constant 0 : index
    %c0_27 = arith.constant 0 : index
    %33 = vector.load %arg11[%c0_26, %c0_27] : memref<32x32xf32, #tpu.memory_space<vmem>>, vector<32x32xf32>
    %cst_28 = arith.constant dense<0.000000e+00> : vector<2x32xf32>
    %34 = tpu.matmul %32, %33, %cst_28 {dimension_numbers = #tpu.dot_dimension_numbers<[1], [0], [0], [1], [0, 0, 1, 1], [], []>} : vector<2x32xf32>, vector<32x32xf32>, vector<2x32xf32> -> vector<2x32xf32>
    %35 = arith.addf %31, %34 : vector<2x32xf32>
    %c0_29 = arith.constant 0 : index
    %c0_30 = arith.constant 0 : index
    %36 = vector.load %arg12[%c0_29, %c0_30] : memref<1x32xf32, #tpu.memory_space<vmem>>, vector<1x32xf32>
    %37 = vector.broadcast %36 : vector<1x32xf32> to vector<2x32xf32>
    %38 = arith.addf %35, %37 : vector<2x32xf32>
    %39 = math.tanh %38 : vector<2x32xf32>
    %c0_31 = arith.constant 0 : index
    %c0_32 = arith.constant 0 : index
    %40 = vector.load %arg13[%c0_31, %c0_32] : memref<32x32xf32, #tpu.memory_space<vmem>>, vector<32x32xf32>
    %cst_33 = arith.constant dense<0.000000e+00> : vector<2x32xf32>
    %41 = tpu.matmul %39, %40, %cst_33 {dimension_numbers = #tpu.dot_dimension_numbers<[1], [0], [0], [1], [0, 0, 1, 1], [], []>} : vector<2x32xf32>, vector<32x32xf32>, vector<2x32xf32> -> vector<2x32xf32>
    %c0_34 = arith.constant 0 : index
    %c0_35 = arith.constant 0 : index
    %42 = vector.load %arg14[%c0_34, %c0_35] : memref<1x32xf32, #tpu.memory_space<vmem>>, vector<1x32xf32>
    %43 = vector.broadcast %42 : vector<1x32xf32> to vector<2x32xf32>
    %44 = arith.addf %41, %43 : vector<2x32xf32>
    %c0_36 = arith.constant 0 : index
    %c0_37 = arith.constant 0 : index
    %45 = vector.load %arg17[%c0_36, %c0_37] : memref<2x32xf32, #tpu.memory_space<vmem>>, vector<2x32xf32>
    tpu.vector_store %arg17[%c0_36, %c0_37], %44 {strides = array<i32>} : memref<2x32xf32, #tpu.memory_space<vmem>>, vector<2x32xf32>,
    %c0_38 = arith.constant 0 : index
    %c0_39 = arith.constant 0 : index
    %46 = vector.load %arg18[%c0_38, %c0_39] : memref<2x32xf32, #tpu.memory_space<vmem>>, vector<2x32xf32>
    tpu.vector_store %arg18[%c0_38, %c0_39], %39 {strides = array<i32>} : memref<2x32xf32, #tpu.memory_space<vmem>>, vector<2x32xf32>,
    %c0_40 = arith.constant 0 : index
    %c0_41 = arith.constant 0 : index
    %47 = vector.load %arg19[%c0_40, %c0_41] : memref<2x32xf32, #tpu.memory_space<vmem>>, vector<2x32xf32>
    tpu.vector_store %arg19[%c0_40, %c0_41], %21 {strides = array<i32>} : memref<2x32xf32, #tpu.memory_space<vmem>>, vector<2x32xf32>,
    return
  }
  func.func @transform_0(%arg0: i32, %arg1: memref<2xi32, #tpu.memory_space<smem>>) -> (i32, i32) {
    %c0_i32 = arith.constant 0 : i32
    %c0_i32_0 = arith.constant 0 : i32
    %c0_i32_1 = arith.constant 0 : i32
    return %c0_i32, %c0_i32_0 : i32, i32
  }
  func.func @transform_1(%arg0: i32, %arg1: memref<2xi32, #tpu.memory_space<smem>>) -> (i32, i32) {
    %c0_i32 = arith.constant 0 : i32
    %c0_i32_0 = arith.constant 0 : i32
    %c0_i32_1 = arith.constant 0 : i32
    return %c0_i32, %c0_i32_0 : i32, i32
  }
  func.func @transform_2(%arg0: i32, %arg1: memref<2xi32, #tpu.memory_space<smem>>) -> (i32, i32) {
    %c0_i32 = arith.constant 0 : i32
    %c0_i32_0 = arith.constant 0 : i32
    %c0_i32_1 = arith.constant 0 : i32
    return %c0_i32, %c0_i32_0 : i32, i32
  }
  func.func @transform_3(%arg0: i32, %arg1: memref<2xi32, #tpu.memory_space<smem>>) -> (i32, i32) {
    %c0_i32 = arith.constant 0 : i32
    %c0_i32_0 = arith.constant 0 : i32
    %c0_i32_1 = arith.constant 0 : i32
    return %c0_i32, %c0_i32_0 : i32, i32
  }
  func.func @transform_4(%arg0: i32, %arg1: memref<2xi32, #tpu.memory_space<smem>>) -> (i32, i32) {
    %c0_i32 = arith.constant 0 : i32
    %c0_i32_0 = arith.constant 0 : i32
    %c0_i32_1 = arith.constant 0 : i32
    return %c0_i32, %c0_i32_0 : i32, i32
  }
  func.func @transform_5(%arg0: i32, %arg1: memref<2xi32, #tpu.memory_space<smem>>) -> (i32, i32) {
    %c0_i32 = arith.constant 0 : i32
    %c0_i32_0 = arith.constant 0 : i32
    %c0_i32_1 = arith.constant 0 : i32
    return %c0_i32, %c0_i32_0 : i32, i32
  }
  func.func @transform_6(%arg0: i32, %arg1: memref<2xi32, #tpu.memory_space<smem>>) -> (i32, i32) {
    %c0_i32 = arith.constant 0 : i32
    %c0_i32_0 = arith.constant 0 : i32
    %c0_i32_1 = arith.constant 0 : i32
    return %c0_i32, %c0_i32_0 : i32, i32
  }
  func.func @transform_7(%arg0: i32, %arg1: memref<2xi32, #tpu.memory_space<smem>>) -> (i32, i32) {
    %c0_i32 = arith.constant 0 : i32
    %c0_i32_0 = arith.constant 0 : i32
    %c0_i32_1 = arith.constant 0 : i32
    return %c0_i32, %c0_i32_0 : i32, i32
  }
  func.func @transform_8(%arg0: i32, %arg1: memref<2xi32, #tpu.memory_space<smem>>) -> (i32, i32) {
    %c0_i32 = arith.constant 0 : i32
    %c0_i32_0 = arith.constant 0 : i32
    %c0_i32_1 = arith.constant 0 : i32
    return %c0_i32, %c0_i32_0 : i32, i32
  }
  func.func @transform_9(%arg0: i32, %arg1: memref<2xi32, #tpu.memory_space<smem>>) -> (i32, i32) {
    %c0_i32 = arith.constant 0 : i32
    %c0_i32_0 = arith.constant 0 : i32
    %c0_i32_1 = arith.constant 0 : i32
    return %c0_i32, %c0_i32_0 : i32, i32
  }
  func.func @transform_10(%arg0: i32, %arg1: memref<2xi32, #tpu.memory_space<smem>>) -> (i32, i32) {
    %c0_i32 = arith.constant 0 : i32
    %c0_i32_0 = arith.constant 0 : i32
    %c0_i32_1 = arith.constant 0 : i32
    return %c0_i32, %c0_i32_0 : i32, i32
  }
  func.func @transform_11(%arg0: i32, %arg1: memref<2xi32, #tpu.memory_space<smem>>) -> (i32, i32) {
    %c0_i32 = arith.constant 0 : i32
    %c0_i32_0 = arith.constant 0 : i32
    %c0_i32_1 = arith.constant 0 : i32
    return %c0_i32, %c0_i32_0 : i32, i32
  }
  func.func @transform_12(%arg0: i32, %arg1: memref<2xi32, #tpu.memory_space<smem>>) -> (i32, i32) {
    %c0_i32 = arith.constant 0 : i32
    %c0_i32_0 = arith.constant 0 : i32
    %c0_i32_1 = arith.constant 0 : i32
    return %c0_i32, %c0_i32_0 : i32, i32
  }
  func.func @transform_13(%arg0: i32, %arg1: memref<2xi32, #tpu.memory_space<smem>>) -> (i32, i32) {
    %c0_i32 = arith.constant 0 : i32
    %c0_i32_0 = arith.constant 0 : i32
    %c0_i32_1 = arith.constant 0 : i32
    return %c0_i32, %c0_i32_0 : i32, i32
  }
  func.func @transform_14(%arg0: i32, %arg1: memref<2xi32, #tpu.memory_space<smem>>) -> (i32, i32) {
    %c0_i32 = arith.constant 0 : i32
    %c0_i32_0 = arith.constant 0 : i32
    %c0_i32_1 = arith.constant 0 : i32
    return %c0_i32, %c0_i32_0 : i32, i32
  }
  func.func @transform_15(%arg0: i32, %arg1: memref<2xi32, #tpu.memory_space<smem>>) -> (i32, i32) {
    %c0_i32 = arith.constant 0 : i32
    %c0_i32_0 = arith.constant 0 : i32
    %c0_i32_1 = arith.constant 0 : i32
    return %c0_i32, %c0_i32_0 : i32, i32
  }
  func.func @transform_16(%arg0: i32, %arg1: memref<2xi32, #tpu.memory_space<smem>>) -> (i32, i32) {
    %c0_i32 = arith.constant 0 : i32
    %c0_i32_0 = arith.constant 0 : i32
    %c0_i32_1 = arith.constant 0 : i32
    return %c0_i32, %c0_i32_0 : i32, i32
  }
  func.func @transform_17(%arg0: i32, %arg1: memref<2xi32, #tpu.memory_space<smem>>) -> (i32, i32) {
    %c0_i32 = arith.constant 0 : i32
    %c0_i32_0 = arith.constant 0 : i32
    %c0_i32_1 = arith.constant 0 : i32
    return %c0_i32, %c0_i32_0 : i32, i32
  }
}

</mosaic_0001>

<bundles_post_ra>
// kernel: _lambda_.1
= control target key start
LH: loop header
LB: loop body
LE: loop exit
PB: predicated region body
PF: predicated region fallthrough
CT: control target
= control target key end

     0   :  { %s1795_s0 = inlined_call_operand.vmem [shape: s32[2], index: 0, kind: input, shape index: {}]   ;;  %s1796_s1 = inlined_call_operand.hbm [shape: f32[32,32], index: 1, kind: input, shape index: {}]   ;;  %s1797_s2 = inlined_call_operand.vmem [shape: f32[32,32], index: 2, kind: input, shape index: {}]   ;;  %s1798_s3 = inlined_call_operand.hbm [shape: f32[32,32], index: 3, kind: input, shape index: {}]   ;;  %s1799_s4 = inlined_call_operand.hbm [shape: f32[1,32], index: 4, kind: input, shape index: {}]   ;;  %s1800_s5 = inlined_call_operand.hbm [shape: f32[32,32], index: 5, kind: input, shape index: {}]   ;;  %s1801_s6 = inlined_call_operand.hbm [shape: f32[1,32], index: 6, kind: input, shape index: {}]   ;;  %s1802_s7 = inlined_call_operand.hbm [shape: f32[32,32], index: 7, kind: input, shape index: {}]   ;;  %s1803_s8 = inlined_call_operand.hbm [shape: f32[32,32], index: 8, kind: input, shape index: {}]   ;;  %s1804_s9 = inlined_call_operand.hbm [shape: f32[32,32], index: 9, kind: input, shape index: {}]   ;;  %s1805_s10 = inlined_call_operand.hbm [shape: f32[32,32], index: 10, kind: input, shape index: {}]   ;;  %s1806_s11 = inlined_call_operand.hbm [shape: f32[1,32], index: 11, kind: input, shape index: {}]   ;;  %s1807_s12 = inlined_call_operand.hbm [shape: f32[32,32], index: 12, kind: input, shape index: {}]   ;;  %s1808_s13 = inlined_call_operand.hbm [shape: f32[1,32], index: 13, kind: input, shape index: {}]   ;;  %s1809_s14 = inlined_call_operand.vmem [shape: f32[2,32], index: 14, kind: input, shape index: {}]   ;;  %s1810_s15 = inlined_call_operand.vmem [shape: f32[2,32], index: 15, kind: input, shape index: {}]   ;;  %s1811_s16 = inlined_call_operand.hbm [shape: f32[2,32], index: 16, kind: output, shape index: {0}]   ;;  %s1812_s17 = inlined_call_operand.vmem [shape: f32[2,32], index: 17, kind: output, shape index: {1}]   ;;  %s1813_s18 = inlined_call_operand.hbm [shape: f32[2,32], index: 18, kind: output, shape index: {2}]  }
   0x1   :  { %1817 = sst [smem:[#allocation37_spill]] %s1795_s0 }
   0x2   :  { %1818 = sst [smem:[#allocation38_spill]] %s1796_s1  ;;  %s1821_s29 = sld [smem:[#allocation37_spill]] }
   0x3   :  { %1819 = sst [smem:[#allocation39_spill]] %s1797_s2 }
   0x4   :  { %1820 = sst [smem:[#allocation40_spill]] %s1807_s12 }
   0x8   :  { %s24_s12 = sshll.u32 %s1821_s29, 4  ;;  %s25_s12 = int_to_ptr.vmem [resolvable:$true] %s24_s12 }
   0x9   :  { %s1048_s30 = scalar_lea.vmem %s25_s12, 16  ;;  %p1053_p1 = scmp.lt.s32.totalorder %s25_s12, %s25_s12 }
   0xa   :  { %p1049_p0 = scmp.ne.s32.totalorder %s25_s12, %s1048_s30  ;;  %p1054_p2 = scmp.lt.s32.totalorder %s1048_s30, %s1048_s30 }
   0xc   :  { %p1055_p3 = por %p1054_p2, %p1053_p1 }
   0xe   :  { %p1056_p4 = pnand %p1055_p3, %p1049_p0 }
  0x10   :  { %1059 = shalt.err (!%p1056_p4)  }
  0x11   :  { %s1388_s0 = smov [#allocation3]  }
  0x12   :  { %27 = dma.vmem_to_smem %s25_s12, 16, %s1388_s0, [#allocation2] }
  0x13   :  { %1368 = dma.done.wait [#allocation2], 16 }
  0x14   :  { %1369 = vsyncadd [#allocation2], 4294967280 }
  0x15   :  { %29 = sfence }
  0x16   :  { %30 = vsyncpa [#allocation5], 0 }
  0x17   :  { %31 = vsyncpa [#allocation8], 0 }
  0x18   :  { %32 = vsyncpa [#allocation11], 0 }
  0x19   :  { %33 = vsyncpa [#allocation14], 0 }
  0x1a   :  { %34 = vsyncpa [#allocation17], 0 }
  0x1b   :  { %35 = vsyncpa [#allocation20], 0 }
  0x1c   :  { %36 = vsyncpa [#allocation23], 0 }
  0x1d   :  { %37 = vsyncpa [#allocation6], 0 }
  0x1e   :  { %38 = vsyncpa [#allocation26], 0  ;;  %s1389_s19 = smov [#allocation7]   ;;  %s1390_s20 = smov [#allocation10]  }
  0x1f   :  { %s58_s1 = sshll.u32 %s1389_s19, 4  ;;  %s80_s21 = sshll.u32 %s1390_s20, 4  ;;  %s59_s1 = int_to_ptr.vmem [resolvable:$true] %s58_s1  ;;  %s1506_s21 = int_to_ptr.vmem [resolvable:$true] %s80_s21 }
  0x20   :  { %s1060_s2 = scalar_lea.hbm %s1798_s3, 512 }
  0x21   :  { %p1061_p5 = scmp.ne.s32.totalorder %s1798_s3, %s1060_s2  ;;  %p1064_p6 = scmp.lt.u32.totalorder %s1060_s2, %s1798_s3 }
  0x23   :  { %p1066_p7 = pnand %p1064_p6, %p1061_p5 }
  0x25   :  { %1069 = shalt.err (!%p1066_p7)
}
  0x26   :  { %s1070_s27 = scalar_lea.vmem %s59_s1, 512  ;;  %p1075_p9 = scmp.lt.s32.totalorder %s59_s1, %s59_s1 }
  0x27   :  { %p1071_p8 = scmp.ne.s32.totalorder %s59_s1, %s1070_s27  ;;  %p1076_p10 = scmp.lt.s32.totalorder %s1070_s27, %s1070_s27 }
  0x29   :  { %p1077_p11 = por %p1076_p10, %p1075_p9 }
  0x2b   :  { %p1078_p12 = pnand %p1077_p11, %p1071_p8 }
  0x2d   :  { %1081 = shalt.err (!%p1078_p12)
}
  0x2e   :  { %s1391_s28 = smov 128   ;;  %s1392_s29 = smov 8  }
  0x2f   :  { %64 = dma.hbm_to_vmem [thread:$0]  %s1798_s3, 512, %s59_s1, [#allocation8], %s1391_s28, %s1391_s28, %s1392_s29  }
  0x30   :  { %s1082_s12 = scalar_lea.hbm %s1800_s5, 512 }
  0x31   :  { %p1083_p13 = scmp.ne.s32.totalorder %s1800_s5, %s1082_s12  ;;  %p1086_p0 = scmp.lt.u32.totalorder %s1082_s12, %s1800_s5 }
  0x33   :  { %p1088_p1 = pnand %p1086_p0, %p1083_p13 }
  0x35   :  { %1091 = shalt.err (!%p1088_p1)
}
  0x36   :  { %s1092_s25 = scalar_lea.vmem %s1506_s21, 512  ;;  %p1097_p3 = scmp.lt.s32.totalorder %s1506_s21, %s1506_s21 }
  0x37   :  { %p1093_p2 = scmp.ne.s32.totalorder %s1506_s21, %s1092_s25  ;;  %p1098_p4 = scmp.lt.s32.totalorder %s1092_s25, %s1092_s25 }
  0x39   :  { %p1099_p5 = por %p1098_p4, %p1097_p3 }
  0x3b   :  { %p1100_p6 = pnand %p1099_p5, %p1093_p2 }
  0x3d   :  { %1103 = shalt.err (!%p1100_p6)
}
  0x3e   :  { %86 = dma.hbm_to_vmem [thread:$0]  %s1800_s5, 512, %s1506_s21, [#allocation11], %s1391_s28, %s1391_s28, %s1392_s29  }
  0x3f   :  { %s1393_s26 = smov [#allocation13]   ;;  %s1394_s30 = smov [#allocation16]  }
  0x40   :  { %s102_s27 = sshll.u32 %s1393_s26, 4  ;;  %s126_s0 = sshll.u32 %s1394_s30, 4  ;;  %s103_s27 = int_to_ptr.vmem [resolvable:$true] %s102_s27  ;;  %s1543_s0 = int_to_ptr.vmem [resolvable:$true] %s126_s0 }
  0x41   :  { %s1104_s12 = scalar_lea.hbm %s1802_s7, 512 }
  0x42   :  { %p1105_p7 = scmp.ne.s32.totalorder %s1802_s7, %s1104_s12  ;;  %p1108_p8 = scmp.lt.u32.totalorder %s1104_s12, %s1802_s7 }
  0x44   :  { %p1110_p9 = pnand %p1108_p8, %p1105_p7 }
  0x46   :  { %1113 = shalt.err (!%p1110_p9)
}
  0x47   :  { %s1114_s5 = scalar_lea.vmem %s103_s27, 512  ;;  %p1119_p11 = scmp.lt.s32.totalorder %s103_s27, %s103_s27 }
  0x48   :  { %p1115_p10 = scmp.ne.s32.totalorder %s103_s27, %s1114_s5  ;;  %p1120_p12 = scmp.lt.s32.totalorder %s1114_s5, %s1114_s5 }
  0x4a   :  { %p1121_p13 = por %p1120_p12, %p1119_p11 }
  0x4c   :  { %p1122_p0 = pnand %p1121_p13, %p1115_p10 }
  0x4e   :  { %1125 = shalt.err (!%p1122_p0)
}
  0x4f   :  { %108 = dma.hbm_to_vmem [thread:$0]  %s1802_s7, 512, %s103_s27, [#allocation14], %s1391_s28, %s1391_s28, %s1392_s29  }
  0x50   :  { %s1126_s26 = scalar_lea.hbm %s1804_s9, 512 }
  0x51   :  { %p1127_p1 = scmp.ne.s32.totalorder %s1804_s9, %s1126_s26  ;;  %p1130_p2 = scmp.lt.u32.totalorder %s1126_s26, %s1804_s9 }
  0x53   :  { %p1132_p3 = pnand %p1130_p2, %p1127_p1 }
  0x55   :  { %1135 = shalt.err (!%p1132_p3)
}
  0x56   :  { %s1136_s22 = scalar_lea.vmem %s1543_s0, 512  ;;  %p1141_p5 = scmp.lt.s32.totalorder %s1543_s0, %s1543_s0 }
  0x57   :  { %p1137_p4 = scmp.ne.s32.totalorder %s1543_s0, %s1136_s22  ;;  %p1142_p6 = scmp.lt.s32.totalorder %s1136_s22, %s1136_s22 }
  0x59   :  { %p1143_p7 = por %p1142_p6, %p1141_p5 }
  0x5b   :  { %p1144_p8 = pnand %p1143_p7, %p1137_p4 }
  0x5d   :  { %1147 = shalt.err (!%p1144_p8)
}
  0x5e   :  { %132 = dma.hbm_to_vmem [thread:$0]  %s1804_s9, 512, %s1543_s0, [#allocation17], %s1391_s28, %s1391_s28, %s1392_s29  }
  0x5f   :  { %s1395_s2 = smov [#allocation19]   ;;  %s1396_s24 = smov [#allocation4]  }
  0x60   :  { %s151_s23 = sshll.u32 %s1395_s2, 4  ;;  %s44_s5 = sshll.u32 %s1396_s24, 4  ;;  %s152_s23 = int_to_ptr.vmem [resolvable:$true] %s151_s23  ;;  %s1580_s5 = int_to_ptr.vmem [resolvable:$true] %s44_s5 }
  0x61   :  { %s1148_s3 = scalar_lea.hbm %s1806_s11, 16 }
  0x62   :  { %p1149_p9 = scmp.ne.s32.totalorder %s1806_s11, %s1148_s3  ;;  %p1152_p10 = scmp.lt.u32.totalorder %s1148_s3, %s1806_s11 }
  0x64   :  { %p1154_p11 = pnand %p1152_p10, %p1149_p9 }
  0x66   :  { %1157 = shalt.err (!%p1154_p11)
}
  0x67   :  { %s1158_s9 = scalar_lea.vmem %s152_s23, 16  ;;  %s1162_s0 = scalar_lea.vmem %s152_s23, 32 }
  0x68   :  { %p1159_p12 = scmp.ne.s32.totalorder %s152_s23, %s1158_s9  ;;  %p1163_p13 = scmp.lt.s32.totalorder %s152_s23, %s152_s23 }
  0x69   :  { %p1164_p0 = scmp.lt.s32.totalorder %s1162_s0, %s1158_s9 }
  0x6b   :  { %p1165_p1 = por %p1164_p0, %p1163_p13 }
  0x6d   :  { %p1166_p2 = pnand %p1165_p1, %p1159_p12 }
  0x6f   :  { %1169 = shalt.err (!%p1166_p2)
}
  0x70   :  { %154 = dma.hbm_to_vmem [thread:$0]  %s1806_s11, 16, %s152_s23, [#allocation20]  }
  0x71   :  { %s1822_s27 = sld [smem:[#allocation38_spill]] }
  0x77   :  { %s1170_s2 = scalar_lea.hbm %s1822_s27, 512 }
  0x78   :  { %p1171_p3 = scmp.ne.s32.totalorder %s1822_s27, %s1170_s2  ;;  %p1174_p4 = scmp.lt.u32.totalorder %s1170_s2, %s1822_s27 }
  0x7a   :  { %p1176_p5 = pnand %p1174_p4, %p1171_p3 }
  0x7c   :  { %1179 = shalt.err (!%p1176_p5)
}
  0x7d   :  { %s1180_s1 = scalar_lea.vmem %s1580_s5, 512  ;;  %p1185_p7 = scmp.lt.s32.totalorder %s1580_s5, %s1580_s5 }
  0x7e   :  { %p1181_p6 = scmp.ne.s32.totalorder %s1580_s5, %s1180_s1  ;;  %p1186_p8 = scmp.lt.s32.totalorder %s1180_s1, %s1180_s1 }
  0x80   :  { %p1187_p9 = por %p1186_p8, %p1185_p7 }
  0x82   :  { %p1188_p10 = pnand %p1187_p9, %p1181_p6 }
  0x84   :  { %1191 = shalt.err (!%p1188_p10)
}
  0x85   :  { %50 = dma.hbm_to_vmem [thread:$0]  %s1822_s27, 512, %s1580_s5, [#allocation5], %s1391_s28, %s1391_s28, %s1392_s29  }
  0x86   :  { %s1397_s26 = smov [#allocation9]   ;;  %s1398_s19 = smov [#allocation12]  }
  0x87   :  { %s71_s30 = sshll.u32 %s1397_s26, 4  ;;  %s93_s9 = sshll.u32 %s1398_s19, 4  ;;  %s72_s30 = int_to_ptr.vmem [resolvable:$true] %s71_s30  ;;  %s94_s9 = int_to_ptr.vmem [resolvable:$true] %s93_s9 }
  0x88   :  { %s1192_s12 = scalar_lea.hbm %s1799_s4, 16 }
  0x89   :  { %p1193_p11 = scmp.ne.s32.totalorder %s1799_s4, %s1192_s12  ;;  %p1196_p12 = scmp.lt.u32.totalorder %s1192_s12, %s1799_s4 }
  0x8b   :  { %p1198_p13 = pnand %p1196_p12, %p1193_p11 }
  0x8d   :  { %1201 = shalt.err (!%p1198_p13)
}
  0x8e   :  { %s1202_s5 = scalar_lea.vmem %s72_s30, 16  ;;  %s1206_s27 = scalar_lea.vmem %s72_s30, 32 }
  0x8f   :  { %p1203_p0 = scmp.ne.s32.totalorder %s72_s30, %s1202_s5  ;;  %p1207_p1 = scmp.lt.s32.totalorder %s72_s30, %s72_s30 }
  0x90   :  { %p1208_p2 = scmp.lt.s32.totalorder %s1206_s27, %s1202_s5 }
  0x92   :  { %p1209_p3 = por %p1208_p2, %p1207_p1 }
  0x94   :  { %p1210_p4 = pnand %p1209_p3, %p1203_p0 }
  0x96   :  { %1213 = shalt.err (!%p1210_p4)
}
  0x97   :  { %74 = dma.hbm_to_vmem [thread:$0]  %s1799_s4, 16, %s72_s30, [#allocation8]  }
  0x98   :  { %s1214_s11 = scalar_lea.hbm %s1801_s6, 16 }
  0x99   :  { %p1215_p5 = scmp.ne.s32.totalorder %s1801_s6, %s1214_s11  ;;  %p1218_p6 = scmp.lt.u32.totalorder %s1214_s11, %s1801_s6 }
  0x9b   :  { %p1220_p7 = pnand %p1218_p6, %p1215_p5 }
  0x9d   :  { %1223 = shalt.err (!%p1220_p7)
}
  0x9e   :  { %s1224_s20 = scalar_lea.vmem %s94_s9, 16  ;;  %s1228_s12 = scalar_lea.vmem %s94_s9, 32 }
  0x9f   :  { %p1225_p8 = scmp.ne.s32.totalorder %s94_s9, %s1224_s20  ;;  %p1229_p9 = scmp.lt.s32.totalorder %s94_s9, %s94_s9 }
  0xa0   :  { %p1230_p10 = scmp.lt.s32.totalorder %s1228_s12, %s1224_s20 }
  0xa2   :  { %p1231_p11 = por %p1230_p10, %p1229_p9 }
  0xa4   :  { %p1232_p12 = pnand %p1231_p11, %p1225_p8 }
  0xa6   :  { %1235 = shalt.err (!%p1232_p12)
}
  0xa7   :  { %96 = dma.hbm_to_vmem [thread:$0]  %s1801_s6, 16, %s94_s9, [#allocation11]  }
  0xa8   :  { %s1399_s22 = smov [#allocation15]   ;;  %s1400_s2 = smov [#allocation18]  }
  0xa9   :  { %s114_s7 = sshll.u32 %s1399_s22, 4  ;;  %s138_s24 = sshll.u32 %s1400_s2, 4  ;;  %s115_s7 = int_to_ptr.vmem [resolvable:$true] %s114_s7  ;;  %s1638_s24 = int_to_ptr.vmem [resolvable:$true] %s138_s24 }
  0xaa   :  { %s1236_s21 = scalar_lea.hbm %s1803_s8, 512 }
  0xab   :  { %p1237_p13 = scmp.ne.s32.totalorder %s1803_s8, %s1236_s21  ;;  %p1240_p0 = scmp.lt.u32.totalorder %s1236_s21, %s1803_s8 }
  0xad   :  { %p1242_p1 = pnand %p1240_p0, %p1237_p13 }
  0xaf   :  { %1245 = shalt.err (!%p1242_p1)
}
  0xb0   :  { %s1246_s6 = scalar_lea.vmem %s115_s7, 512  ;;  %p1251_p3 = scmp.lt.s32.totalorder %s115_s7, %s115_s7 }
  0xb1   :  { %p1247_p2 = scmp.ne.s32.totalorder %s115_s7, %s1246_s6  ;;  %p1252_p4 = scmp.lt.s32.totalorder %s1246_s6, %s1246_s6 }
  0xb3   :  { %p1253_p5 = por %p1252_p4, %p1251_p3 }
  0xb5   :  { %p1254_p6 = pnand %p1253_p5, %p1247_p2 }
  0xb7   :  { %1257 = shalt.err (!%p1254_p6)
}
  0xb8   :  { %120 = dma.hbm_to_vmem [thread:$0]  %s1803_s8, 512, %s115_s7, [#allocation14], %s1391_s28, %s1391_s28, %s1392_s29  }
  0xb9   :  { %s1258_s0 = scalar_lea.hbm %s1805_s10, 512 }
  0xba   :  { %p1259_p7 = scmp.ne.s32.totalorder %s1805_s10, %s1258_s0  ;;  %p1262_p8 = scmp.lt.u32.totalorder %s1258_s0, %s1805_s10 }
  0xbc   :  { %p1264_p9 = pnand %p1262_p8, %p1259_p7 }
  0xbe   :  { %1267 = shalt.err (!%p1264_p9)
}
  0xbf   :  { %s1268_s22 = scalar_lea.vmem %s1638_s24, 512  ;;  %p1273_p11 = scmp.lt.s32.totalorder %s1638_s24, %s1638_s24 }
  0xc0   :  { %p1269_p10 = scmp.ne.s32.totalorder %s1638_s24, %s1268_s22  ;;  %p1274_p12 = scmp.lt.s32.totalorder %s1268_s22, %s1268_s22 }
  0xc2   :  { %p1275_p13 = por %p1274_p12, %p1273_p11 }
  0xc4   :  { %p1276_p0 = pnand %p1275_p13, %p1269_p10 }
  0xc6   :  { %1279 = shalt.err (!%p1276_p0)
}
  0xc7   :  { %144 = dma.hbm_to_vmem [thread:$0]  %s1805_s10, 512, %s1638_s24, [#allocation17], %s1391_s28, %s1391_s28, %s1392_s29  }
  0xc8   :  { %s1401_s2 = smov [#allocation21]   ;;  %s1402_s27 = smov [#allocation22]  }
  0xc9   :  { %s160_s5 = sshll.u32 %s1401_s2, 4  ;;  %s173_s21 = sshll.u32 %s1402_s27, 4  ;;  %s161_s5 = int_to_ptr.vmem [resolvable:$true] %s160_s5  ;;  %s174_s21 = int_to_ptr.vmem [resolvable:$true] %s173_s21 }
  0xca   :  { %s1823_s1 = sld [smem:[#allocation40_spill]] }
  0xd0   :  { %s1280_s11 = scalar_lea.hbm %s1823_s1, 512 }
  0xd1   :  { %p1281_p1 = scmp.ne.s32.totalorder %s1823_s1, %s1280_s11  ;;  %p1284_p2 = scmp.lt.u32.totalorder %s1280_s11, %s1823_s1 }
  0xd3   :  { %p1286_p3 = pnand %p1284_p2, %p1281_p1 }
  0xd5   :  { %1289 = shalt.err (!%p1286_p3)
}
  0xd6   :  { %s1290_s10 = scalar_lea.vmem %s161_s5, 512  ;;  %p1295_p5 = scmp.lt.s32.totalorder %s161_s5, %s161_s5 }
  0xd7   :  { %p1291_p4 = scmp.ne.s32.totalorder %s161_s5, %s1290_s10  ;;  %p1296_p6 = scmp.lt.s32.totalorder %s1290_s10, %s1290_s10 }
  0xd9   :  { %p1297_p7 = por %p1296_p6, %p1295_p5 }
  0xdb   :  { %p1298_p8 = pnand %p1297_p7, %p1291_p4 }
  0xdd   :  { %1301 = shalt.err (!%p1298_p8)
}
  0xde   :  { %166 = dma.hbm_to_vmem [thread:$0]  %s1823_s1, 512, %s161_s5, [#allocation20], %s1391_s28, %s1391_s28, %s1392_s29  }
  0xdf   :  { %s1302_s12 = scalar_lea.hbm %s1808_s13, 16 }
  0xe0   :  { %p1303_p9 = scmp.ne.s32.totalorder %s1808_s13, %s1302_s12  ;;  %p1306_p10 = scmp.lt.u32.totalorder %s1302_s12, %s1808_s13 }
  0xe2   :  { %p1308_p11 = pnand %p1306_p10, %p1303_p9 }
  0xe4   :  { %1311 = shalt.err (!%p1308_p11)
}
  0xe5   :  { %s1312_s7 = scalar_lea.vmem %s174_s21, 16  ;;  %s1316_s2 = scalar_lea.vmem %s174_s21, 32 }
  0xe6   :  { %p1313_p12 = scmp.ne.s32.totalorder %s174_s21, %s1312_s7  ;;  %p1317_p13 = scmp.lt.s32.totalorder %s174_s21, %s174_s21 }
  0xe7   :  { %p1318_p0 = scmp.lt.s32.totalorder %s1316_s2, %s1312_s7 }
  0xe9   :  { %p1319_p1 = por %p1318_p0, %p1317_p13 }
  0xeb   :  { %p1320_p2 = pnand %p1319_p1, %p1313_p12 }
  0xed   :  { %1323 = shalt.err (!%p1320_p2)
}
  0xee   :  { %176 = dma.hbm_to_vmem [thread:$0]  %s1808_s13, 16, %s174_s21, [#allocation23]  }
  0xef   :  { %1370 = dma.done.wait [#allocation5], 512  }
  0xf0   :  { %1371 = vsyncadd [#allocation5], 4294966784 }
  0xf1   :  { %1372 = dma.done.wait [#allocation8], 528  }
  0xf2   :  { %1373 = vsyncadd [#allocation8], 4294966768 }
  0xf3   :  { %1374 = dma.done.wait [#allocation11], 528  }
  0xf4   :  { %1375 = vsyncadd [#allocation11], 4294966768 }
  0xf5   :  { %1376 = dma.done.wait [#allocation14], 1024  }
  0xf6   :  { %1377 = vsyncadd [#allocation14], 4294966272 }
  0xf7   :  { %1378 = dma.done.wait [#allocation17], 1024  }
  0xf8   :  { %1379 = vsyncadd [#allocation17], 4294966272 }
  0xf9   :  { %1380 = dma.done.wait [#allocation20], 528  }
  0xfa   :  { %1381 = vsyncadd [#allocation20], 4294966768 }
  0xfb   :  { %1382 = dma.done.wait [#allocation23], 16  }
  0xfc   :  { %1383 = vsyncadd [#allocation23], 4294967280  ;;  %v1403_v0 = vmov 0.0|0.0   ;;  %s1704_s13 = sld [smem:[#allocation3]]  ;;  %s1706_s5 = sld [smem:[#allocation3 + $0x1]]  ;;  %vm1404_vm0 = vmmov 0  }
  0xfd   :  { %982 = vmatprep.subr.bf16.mxu0 %v1403_v0  ;;  %988 = vmatprep.subr.bf16.mxu1 %v1403_v0  ;;  %v1405_v1 = vmov 0.0   ;;  %v241_v2 = vld [vmem:[#allocation7] sm:$0xff]  ;;  %v242_v3 = vld [vmem:[#allocation7 + $0x8] sm:$0xff]  ;;  %s1824_s25 = sld [smem:[#allocation39_spill]]  ;;  %v243_v7 = vld [vmem:[#allocation7 + $0x10] sm:$0xff]  ;;  %vm230_vm1 = vcmask 1040384  }
  0xfe   :  { %913 = vmatprep.mubr.msk.f32.mxu0 %vm1404_vm0, %v1405_v1  ;;  %924 = vmatprep.mubr.msk.f32.mxu1 %vm1404_vm0, %v1405_v1  ;;  %v983_v5 = vpack.c.bf16 %v242_v3, %v241_v2  ;;  %v244_v8 = vld [vmem:[#allocation7 + $0x18] sm:$0xff]  ;;  %v240_v17 = vld [vmem:[%s1810_s15] sm:$0x3]  ;;  %vm245_vm2 = vcmask 261120   ;;  %v401_v19 = vld [vmem:[#allocation10] sm:$0xff]  ;;  %vm811_vm3 = vcmask 254976  }
  0xff   :  { %v986_v12 = vpack.c.bf16 %v244_v8, %v243_v7  ;;  %v402_v20 = vld [vmem:[#allocation10 + $0x8] sm:$0xff]  ;;  %v403_v21 = vld [vmem:[#allocation10 + $0x10] sm:$0xff]  ;;  %v404_v23 = vld [vmem:[#allocation10 + $0x18] sm:$0xff]  ;;  %s1406_s30 = smov [#allocation25]  }
 0x100   :  { %984 = vmatpush3.bf16.msra.mxu0 %v983_v5  ;;  %v995_v22 = vpack.c.bf16 %v402_v20, %v401_v19  ;;  %v998_v24 = vpack.c.bf16 %v404_v23, %v403_v21  ;;  %v489_v25 = vld [vmem:[#allocation16] sm:$0xff]  ;;  %v490_v26 = vld [vmem:[#allocation16 + $0x8] sm:$0xff]  ;;  %v491_v28 = vld [vmem:[#allocation16 + $0x10] sm:$0xff]  ;;  %s833_s22 = sshll.u32 %s1406_s30, 4  ;;  %s834_s22 = int_to_ptr.vmem [resolvable:$true] %s833_s22 }
 0x101   :  { %985 = vmatprep.subr.bf16.mxu0 %v1403_v0  ;;  %v1001_v27 = vpack.c.bf16 %v490_v26, %v489_v25  ;;  %v492_v29 = vld [vmem:[#allocation16 + $0x18] sm:$0xff]  ;;  %v485_v38 = vld [vmem:[#allocation15] sm:$0xff]  ;;  %v486_v39 = vld [vmem:[#allocation15 + $0x8] sm:$0xff]  ;;  %s1324_s8 = scalar_lea.vmem %s834_s22, 32  ;;  %p1329_p4 = scmp.lt.s32.totalorder %s834_s22, %s834_s22 }
 0x102   :  { %s223_s26 = scalar_lea.vmem [#allocation4], %s1706_s5  ;;  %s218_s10 = scalar_lea.vmem [#allocation4], %s1704_s13  ;;  %v1004_v30 = vpack.c.bf16 %v492_v29, %v491_v28  ;;  %v861_v33 = vld [vmem:[#allocation9] ss:$0 sm:$0xff]  ;;  %v1007_v40 = vpack.c.bf16 %v486_v39, %v485_v38  ;;  %v487_v42 = vld [vmem:[#allocation15 + $0x10] sm:$0xff]  ;;  %v640_v49 = vld [vmem:[#allocation18] sm:$0xff] }
 0x103   :  { %v236_v4 = vld [vmem:[%s1824_s25] sm:$0xff]  ;;  %v237_v6 = vld [vmem:[%s1824_s25 + $0x8] sm:$0xff]  ;;  %v238_v10 = vld [vmem:[%s1824_s25 + $0x10] sm:$0xff]  ;;  %s225_s15 = scalar_lea.vmem [#allocation13], %s1706_s5  ;;  %s220_s0 = scalar_lea.vmem [#allocation13], %s1704_s13 }
 0x104   :  { %v989_v9 = vpack.c.bf16 %v237_v6, %v236_v4  ;;  %v239_v11 = vld [vmem:[%s1824_s25 + $0x18] sm:$0xff]  ;;  %v224_v13 = vld [vmem:[%s223_s26] sm:$0x1]  ;;  %987 = vmatpush3.bf16.msra.mxu0 %v986_v12  ;;  %v488_v43 = vld [vmem:[#allocation15 + $0x18] sm:$0xff]  ;;  %p1325_p3 = scmp.ne.s32.totalorder %s834_s22, %s1324_s8  ;;  %p1330_p5 = scmp.lt.s32.totalorder %s1324_s8, %s1324_s8 }
 0x105   :  { %v992_v14 = vpack.c.bf16 %v239_v11, %v238_v10  ;;  %v228_v15 = vrot.slane %v224_v13, 7  ;;  %v219_v16 = vld [vmem:[%s218_s10] sm:$0x1]  ;;  %994 = vmatprep.subr.bf16.mxu0 %v1403_v0  ;;  %v1010_v44 = vpack.c.bf16 %v488_v43, %v487_v42  ;;  %v862_v51 = vld [vmem:[#allocation12] ss:$0 sm:$0xff]  ;;  %v642_v56 = vld [vmem:[#allocation18 + $0x10] sm:$0xff] }
 0x106   :  { %990 = vmatpush3.bf16.msra.mxu1 %v989_v9  ;;  %v226_v45 = vld [vmem:[%s225_s15] sm:$0x1]  ;;  %v643_v57 = vld [vmem:[#allocation18 + $0x18] sm:$0xff]  ;;  %v727_v62 = vld [vmem:[#allocation21] sm:$0xff]  ;;  %p1331_p6 = por %p1330_p5, %p1329_p4 }
 0x107   :  { %991 = vmatprep.subr.bf16.mxu1 %v1403_v0  ;;  %v231_v18 = vsel %vm230_vm1, %v219_v16, %v228_v15  ;;  %914 = vmatmul.mubr.msk.f32.vlgmr.msra.gmra.mrb[0].mxu0 %vm245_vm2, %v240_v17  ;;  %v233_v46 = vrot.slane %v226_v45, 7  ;;  %v221_v47 = vld [vmem:[%s220_s0] sm:$0x1]  ;;  %v1016_v58 = vpack.c.bf16 %v643_v57, %v642_v56  ;;  %v729_v2 = vld [vmem:[#allocation21 + $0x10] sm:$0xff]  ;;  %v730_v4 = vld [vmem:[#allocation21 + $0x18] sm:$0xff] }
 0x108   :  { %935 = vmatprep.mubr.msk.f32.mxu0 %vm1404_vm0, %v1405_v1  ;;  %996 = vmatpush3.bf16.msra.mxu0 %v995_v22  ;;  %v641_v50 = vld [vmem:[#allocation18 + $0x8] sm:$0xff]  ;;  %v1022_v5 = vpack.c.bf16 %v730_v4, %v729_v2  ;;  %v867_v9 = vld [vmem:[#allocation19] ss:$0 sm:$0xff]  ;;  %p1332_p7 = pnand %p1331_p6, %p1325_p3 }
 0x109   :  { %997 = vmatprep.subr.bf16.mxu0 %v1403_v0  ;;  %v235_v48 = vsel %vm230_vm1, %v221_v47, %v233_v46  ;;  %v1013_v53 = vpack.c.bf16 %v641_v50, %v640_v49  ;;  %v639_v59 = vld [vmem:[%s1809_s14] sm:$0x3] }
 0x10a   :  { %993 = vmatpush3.bf16.msra.mxu1 %v992_v14  ;;  %v728_v63 = vld [vmem:[#allocation21 + $0x8] sm:$0xff] }
 0x10b   :  { %1000 = vmatprep.subr.bf16.mxu1 %v1403_v0  ;;  %v1019_v3 = vpack.c.bf16 %v728_v63, %v727_v62 }
 0x10c   :  { %999 = vmatpush3.bf16.msra.mxu0 %v998_v24 }
 0x10d   :  { %925 = vmatmul.mubr.msk.f32.vlgmr.msra.gmra.mrb[0].mxu1 %vm245_vm2, %v231_v18  ;;  %1006 = vmatprep.subr.bf16.mxu0 %v1403_v0 }
 0x10e   :  { %946 = vmatprep.mubr.msk.f32.mxu1 %vm1404_vm0, %v1405_v1  ;;  %1002 = vmatpush3.bf16.msra.mxu1 %v1001_v27 }
 0x10f   :  { %1003 = vmatprep.subr.bf16.mxu1 %v1403_v0 }
 0x112   :  { %1005 = vmatpush3.bf16.msra.mxu1 %v1004_v30 }
 0x113   :  { %1012 = vmatprep.subr.bf16.mxu1 %v1403_v0 }
 0x1da   :  { %v315_v31 = vpop.f32.mrb[0].mxu0 }
 0x1db   :  { %v915_v34 = vpop.f32.mrb[1].mxu0 }
 0x1e0   :  { %v388_v32 = vpop.f32.mrb[0].mxu1 }
 0x1e1   :  { %v389_v35 = vadd.f32 %v388_v32, %v315_v31  ;;  %v926_v36 = vpop.f32.mrb[1].mxu1 }
 0x1e3   :  { %v399_v37 = vadd.f32 %v861_v33, %v389_v35 }
 0x1e5   :  { %1044 = vtanh.f32 %v399_v37 }
 0x1ef   :  { %v1045_v41 = vpop.eup %1044 }
 0x1f0   :  { %936 = vmatmul.mubr.msk.f32.vlgmr.msra.gmra.mrb[2].mxu0 %vm245_vm2, %v1045_v41  ;;  %814 = vst.msk [vmem:[#allocation25] sm:$0x3] %vm811_vm3, %v1045_v41 }
 0x1f1   :  { %1008 = vmatpush3.bf16.msra.mxu0 %v1007_v40  ;;  %957 = vmatprep.mubr.msk.f32.mxu0 %vm1404_vm0, %v1405_v1 }
 0x1f2   :  { %1009 = vmatprep.subr.bf16.mxu0 %v1403_v0 }
 0x1f5   :  { %1011 = vmatpush3.bf16.msra.mxu0 %v1010_v44 }
 0x1f6   :  { %1018 = vmatprep.subr.bf16.mxu0 %v1403_v0 }
 0x1f8   :  { %958 = vmatmul.mubr.msk.f32.vlgmr.msra.gmra.mrb[4].mxu0 %vm245_vm2, %v235_v48 }
 0x1f9   :  { %979 = vmatprep.mubr.msk.f32.mxu0 %vm1404_vm0, %v1405_v1  ;;  %1020 = vmatpush3.bf16.msra.mxu0 %v1019_v3 }
 0x1fa   :  { %1021 = vmatprep.subr.bf16.mxu0 %v1403_v0 }
 0x1fd   :  { %1023 = vmatpush3.bf16.msra.mxu0 %v1022_v5 }
 0x2c3   :  { %v481_v52 = vpop.f32.mrb[2].mxu0 }
 0x2c4   :  { %v482_v54 = vadd.f32 %v862_v51, %v481_v52  ;;  %v937_v55 = vpop.f32.mrb[3].mxu0 }
 0x2c6   :  { %947 = vmatmul.mubr.msk.f32.vlgmr.msra.gmra.mrb[2].mxu1 %vm245_vm2, %v482_v54 }
 0x2c7   :  { %1014 = vmatpush3.bf16.msra.mxu1 %v1013_v53  ;;  %968 = vmatprep.mubr.msk.f32.mxu1 %vm1404_vm0, %v1405_v1 }
 0x2c8   :  { %1015 = vmatprep.subr.bf16.mxu1 %v1403_v0 }
 0x2cb   :  { %1017 = vmatpush3.bf16.msra.mxu1 %v1016_v58  ;;  %v635_v60 = vpop.f32.mrb[4].mxu0 }
 0x2cc   :  { %v959_v61 = vpop.f32.mrb[5].mxu0 }
 0x2ce   :  { %969 = vmatmul.mubr.msk.f32.vlgmr.msra.gmra.mrb[4].mxu1 %vm245_vm2, %v639_v59 }
 0x399   :  { %v562_v1 = vpop.f32.mrb[2].mxu1 }
 0x39a   :  { %v636_v6 = vadd.f32 %v635_v60, %v562_v1  ;;  %v948_v7 = vpop.f32.mrb[3].mxu1 }
 0x3a1   :  { %v713_v8 = vpop.f32.mrb[4].mxu1 }
 0x3a2   :  { %v717_v10 = vadd.f32 %v713_v8, %v636_v6  ;;  %v970_v11 = vpop.f32.mrb[5].mxu1 }
 0x3a4   :  { %v725_v12 = vadd.f32 %v867_v9, %v717_v10 }
 0x3a6   :  { %1046 = vtanh.f32 %v725_v12 }
 0x3b0   :  { %v1047_v13 = vpop.eup %1046 }
 0x3b1   :  { %980 = vmatmul.mubr.msk.f32.vlgmr.msra.gmra.mrb[6].mxu0 %vm245_vm2, %v1047_v13  ;;  %813 = vst.msk [vmem:[%s1812_s17] sm:$0x3] %vm811_vm3, %v1047_v13 }
 0x3b2   :  { %1335 = shalt.err (!%p1332_p7)
}
 0x3b3   :  { %s1336_s28 = scalar_lea.hbm %s1813_s18, 32 }
 0x3b4   :  { %p1337_p8 = scmp.ne.s32.totalorder %s1813_s18, %s1336_s28  ;;  %p1340_p9 = scmp.lt.u32.totalorder %s1336_s28, %s1813_s18 }
 0x3b6   :  { %p1342_p10 = pnand %p1340_p9, %p1337_p8 }
 0x3b8   :  { %1345 = shalt.err (!%p1342_p10)
}
 0x3b9   :  { %836 = dma.vmem_to_hbm [thread:$0]  %s834_s22, 32, %s1813_s18, [#allocation26]   ;;  %v868_v0 = vld [vmem:[#allocation22] ss:$0 sm:$0xff] }
 0x3ba   :  { %s1407_s25 = smov [#allocation24]  }
 0x3bb   :  { %s821_s3 = sshll.u32 %s1407_s25, 4  ;;  %s822_s3 = int_to_ptr.vmem [resolvable:$true] %s821_s3 }
 0x3bc   :  { %s1346_s1 = scalar_lea.vmem %s822_s3, 32  ;;  %p1351_p12 = scmp.lt.s32.totalorder %s822_s3, %s822_s3 }
 0x3bd   :  { %p1347_p11 = scmp.ne.s32.totalorder %s822_s3, %s1346_s1  ;;  %p1352_p13 = scmp.lt.s32.totalorder %s1346_s1, %s1346_s1 }
 0x3bf   :  { %p1353_p0 = por %p1352_p13, %p1351_p12 }
 0x3c1   :  { %p1354_p1 = pnand %p1353_p0, %p1347_p11 }
 0x484   :  { %v807_v14 = vpop.f32.mrb[6].mxu0 }
 0x485   :  { %v808_v15 = vadd.f32 %v868_v0, %v807_v14  ;;  %v981_v16 = vpop.f32.mrb[7].mxu0 }
 0x487   :  { %812 = vst.msk [vmem:[#allocation24] sm:$0x3] %vm811_vm3, %v808_v15 }
 0x488   :  { %1357 = shalt.err (!%p1354_p1)
}
 0x489   :  { %s1358_s18 = scalar_lea.hbm %s1811_s16, 32 }
 0x48a   :  { %p1359_p2 = scmp.ne.s32.totalorder %s1811_s16, %s1358_s18  ;;  %p1362_p3 = scmp.lt.u32.totalorder %s1358_s18, %s1811_s16 }
 0x48c   :  { %p1364_p4 = pnand %p1362_p3, %p1359_p2 }
 0x48e   :  { %1367 = shalt.err (!%p1364_p4)
}
 0x48f   :  { %824 = dma.vmem_to_hbm [thread:$0]  %s822_s3, 32, %s1811_s16, [#allocation6]  }
 0x490   :  { %1384 = dma.done.wait [#allocation6], 32  }
 0x491   :  { %1385 = vsyncadd [#allocation6], 4294967264 }
 0x492   :  { %1386 = dma.done.wait [#allocation26], 32  }
 0x493   :  { %1387 = vsyncadd [#allocation26], 4294967264 }
 0x494   :  { %845 = vsyncpa [#allocation5], 1 }
 0x495   :  { %846 = vsyncpa [#allocation8], 1 }
 0x496   :  { %847 = vsyncpa [#allocation11], 1 }
 0x497   :  { %848 = vsyncpa [#allocation14], 1 }
 0x498   :  { %849 = vsyncpa [#allocation17], 1 }
 0x499   :  { %850 = vsyncpa [#allocation20], 1 }
 0x49a   :  { %851 = vsyncpa [#allocation23], 1 }
 0x49b   :  { %852 = vsyncpa [#allocation6], 1 }
 0x49c   :  { %853 = vsyncpa [#allocation26], 1 }

</bundles_post_ra>
